<compile_context>
chip_gen: v7x
topology: tpu7x:2x2x1
jax: 0.10.0
libtpu: 0.0.40
codegen_flags: <defaults>
</compile_context>

<pallas_src>
import jax
import jax.numpy as jnp
from jax.experimental import pallas as pl
from jax.experimental.pallas import tpu as pltpu


def _nw_kernel(w_ref, q_ref, k_ref, v_ref, o_ref):
    # Fold scalar algebra: ((q - k) * w)^2 / 2 == (q - k)^2 * (0.5 * w * w)
    c = 0.5 * w_ref[0] * w_ref[0]

    q = q_ref[...]                    # (1, TILE_N)  -- sublane-broadcast below
    k = k_ref[...]                    # (m, TILE_N)
    v = v_ref[...]                    # (m, TILE_N)

    diff = q - k
    y2 = diff * diff * c              # positive exponent (matches the module)

    # Softmax along the m (sublane) axis, numerically stabilized, with the
    # divide fused into the final weighted sum (one reciprocal per column).
    m_max = jnp.max(y2, axis=0, keepdims=True)       # (1, TILE_N)
    e = jnp.exp(y2 - m_max)                          # (m, TILE_N)
    denom = jnp.sum(e, axis=0, keepdims=True)        # (1, TILE_N)
    num = jnp.sum(e * v, axis=0, keepdims=True)      # (1, TILE_N)
    o_ref[...] = num * pl.reciprocal(denom, approx=True)


def _round_up(x, k):
    return (x + k - 1) // k * k


def _pick_tile_n(n, m, vmem_budget_bytes=20 * 1024 * 1024, max_tile_n=None):
    """Largest 128-multiple lane tile whose double-buffered working set fits
    the VMEM budget (keys + values dominate: 2 arrays x 2 buffers x m x tile x
    4 B), never larger than n rounded up to a lane multiple."""
    bytes_per_lane = 2 * 2 * m * 4 + 4 * 2 * 4       # k/v blocks + q/out rows
    tile = vmem_budget_bytes // max(bytes_per_lane, 1)
    tile = max(128, (tile // 128) * 128)
    tile = min(tile, _round_up(n, 128))
    if max_tile_n is not None:
        tile = min(tile, max(128, (max_tile_n // 128) * 128))
    return tile


def nw_kernel_regression(queries, keys, values, w, *, max_tile_n=None):
    """queries: (n,), keys/values: (n, m), w: (1,)  ->  (n,) float32."""
    n, m = keys.shape

    # Lane-dense transposed layout: n (outputs) on lanes, m (keys) on sublanes.
    q_t = queries.reshape(1, n).astype(jnp.float32)
    k_t = keys.astype(jnp.float32).T                 # (m, n)
    v_t = values.astype(jnp.float32).T               # (m, n)
    w = w.astype(jnp.float32).reshape(1)

    tile_n = _pick_tile_n(n, m, max_tile_n=max_tile_n)
    n_pad = _round_up(n, tile_n)
    if n_pad != n:
        # Zero-padded columns are independent (softmax over a column of zeros,
        # no NaN/inf) and are sliced off below.
        pad = ((0, 0), (0, n_pad - n))
        q_t = jnp.pad(q_t, pad)
        k_t = jnp.pad(k_t, pad)
        v_t = jnp.pad(v_t, pad)

    out = pl.pallas_call(
        _nw_kernel,
        out_shape=jax.ShapeDtypeStruct((1, n_pad), jnp.float32),
        grid=(n_pad // tile_n,),
        in_specs=[
            pl.BlockSpec(memory_space=pltpu.SMEM),           # w (scalar param)
            pl.BlockSpec((1, tile_n), lambda i: (0, i)),     # queries (1, n)
            pl.BlockSpec((m, tile_n), lambda i: (0, i)),     # keys^T  (m, n)
            pl.BlockSpec((m, tile_n), lambda i: (0, i)),     # values^T(m, n)
        ],
        out_specs=pl.BlockSpec((1, tile_n), lambda i: (0, i)),
        compiler_params=pltpu.CompilerParams(
            dimension_semantics=("parallel",),               # megacore / v7x 2 TCs
            vmem_limit_bytes=32 * 1024 * 1024,               # lift v5e 16 MiB default
        ),
        cost_estimate=pl.CostEstimate(
            flops=6 * n_pad * m,
            transcendentals=n_pad * m,
            bytes_accessed=2 * n_pad * m * 4 + 3 * n_pad * 4,
        ),
    )(w, q_t, k_t, v_t)
    return out[0, :n]


def _reference(queries, keys, values, w):
    q = jnp.broadcast_to(queries[:, None], keys.shape)
    y1 = -((q - keys) * w[0])
    y2 = y1 ** 2 / 2
    attn = jax.nn.softmax(y2, axis=1)
    return jnp.sum(attn * values, axis=1)


if __name__ == "__main__":
    key = jax.random.PRNGKey(0)
    k1, k2, k3, k4, k5, k6 = jax.random.split(key, 6)

    # Canonical NW-regression shapes: n train queries, m = n - 1 keys each.
    n, m = 50, 49
    queries = jax.random.normal(k1, (n,), dtype=jnp.float32)
    keys = jax.random.normal(k2, (n, m), dtype=jnp.float32)
    values = jax.random.normal(k3, (n, m), dtype=jnp.float32)
    # Deterministic stand-in for the module's torch.rand((1,)) parameter.
    w = jnp.array([0.5], dtype=jnp.float32)

    y = jax.block_until_ready(nw_kernel_regression(queries, keys, values, w))
    y_ref = _reference(queries, keys, values, w)
    assert y.shape == (n,)
    # approx=True reciprocal (EUP vrcp) carries ~1e-4 relative error.
    assert jnp.allclose(y, y_ref, atol=2e-3, rtol=2e-3), \
        float(jnp.max(jnp.abs(y - y_ref)))

    # Second case exercising a multi-step grid (3 tiles) and lane padding.
    n2, m2 = 300, 20
    q2 = jax.random.normal(k4, (n2,), dtype=jnp.float32)
    k2_ = jax.random.normal(k5, (n2, m2), dtype=jnp.float32)
    v2 = jax.random.normal(k6, (n2, m2), dtype=jnp.float32)
    y2 = jax.block_until_ready(
        nw_kernel_regression(q2, k2_, v2, w, max_tile_n=128))
    y2_ref = _reference(q2, k2_, v2, w)
    assert y2.shape == (n2,)
    assert jnp.allclose(y2, y2_ref, atol=2e-3, rtol=2e-3), \
        float(jnp.max(jnp.abs(y2 - y2_ref)))

    print("KERNEL_OK")
</pallas_src>

<mosaic_0001>
module attributes {stable_mosaic.version = 11 : i64} {
  func.func @_nw_kernel(%arg0: i32, %arg1: memref<1xf32, #tpu.memory_space<smem>>, %arg2: memref<1x128xf32, #tpu.memory_space<vmem>>, %arg3: memref<49x128xf32, #tpu.memory_space<vmem>>, %arg4: memref<49x128xf32, #tpu.memory_space<vmem>>, %arg5: memref<1x128xf32, #tpu.memory_space<vmem>>) attributes {dimension_semantics = [#tpu.dimension_semantics<parallel>], iteration_bounds = array<i64: 1>, scalar_prefetch = 0 : i64, scratch_operands = 0 : i64, tpu.core_type = #tpu.core_type<tc>, window_params = [{transform_indices = @transform_0, window_bounds = array<i64: 1>}, {transform_indices = @transform_1, window_bounds = array<i64: 1, 128>}, {transform_indices = @transform_2, window_bounds = array<i64: 49, 128>}, {transform_indices = @transform_3, window_bounds = array<i64: 49, 128>}, {transform_indices = @transform_4, window_bounds = array<i64: 1, 128>}]} {
    %c0 = arith.constant 0 : index
    %0 = memref.load %arg1[%c0] : memref<1xf32, #tpu.memory_space<smem>>
    %cst = arith.constant 5.000000e-01 : f32
    %1 = arith.mulf %cst, %0 : f32
    %c0_0 = arith.constant 0 : index
    %2 = memref.load %arg1[%c0_0] : memref<1xf32, #tpu.memory_space<smem>>
    %3 = arith.mulf %1, %2 : f32
    %c0_1 = arith.constant 0 : index
    %c0_2 = arith.constant 0 : index
    %4 = vector.load %arg2[%c0_1, %c0_2] : memref<1x128xf32, #tpu.memory_space<vmem>>, vector<1x128xf32>
    %c0_3 = arith.constant 0 : index
    %c0_4 = arith.constant 0 : index
    %5 = vector.load %arg3[%c0_3, %c0_4] : memref<49x128xf32, #tpu.memory_space<vmem>>, vector<49x128xf32>
    %c0_5 = arith.constant 0 : index
    %c0_6 = arith.constant 0 : index
    %6 = vector.load %arg4[%c0_5, %c0_6] : memref<49x128xf32, #tpu.memory_space<vmem>>, vector<49x128xf32>
    %7 = vector.broadcast %4 : vector<1x128xf32> to vector<49x128xf32>
    %8 = arith.subf %7, %5 : vector<49x128xf32>
    %9 = arith.mulf %8, %8 : vector<49x128xf32>
    %10 = vector.broadcast %3 : f32 to vector<49x128xf32>
    %11 = arith.mulf %9, %10 : vector<49x128xf32>
    %cst_7 = arith.constant dense<0xFF800000> : vector<128xf32>
    %12 = vector.multi_reduction <maximumf>, %11, %cst_7 [0] : vector<49x128xf32> to vector<128xf32>
    %13 = vector.shape_cast %12 : vector<128xf32> to vector<1x128xf32>
    %14 = vector.broadcast %13 : vector<1x128xf32> to vector<49x128xf32>
    %15 = arith.subf %11, %14 : vector<49x128xf32>
    %16 = math.exp %15 : vector<49x128xf32>
    %cst_8 = arith.constant dense<0.000000e+00> : vector<128xf32>
    %17 = vector.multi_reduction <add>, %16, %cst_8 [0] : vector<49x128xf32> to vector<128xf32>
    %18 = vector.shape_cast %17 : vector<128xf32> to vector<1x128xf32>
    %19 = arith.mulf %16, %6 : vector<49x128xf32>
    %cst_9 = arith.constant dense<0.000000e+00> : vector<128xf32>
    %20 = vector.multi_reduction <add>, %19, %cst_9 [0] : vector<49x128xf32> to vector<128xf32>
    %21 = vector.shape_cast %20 : vector<128xf32> to vector<1x128xf32>
    %22 = tpu.reciprocal %18 {approx = true} : vector<1x128xf32> -> vector<1x128xf32>
    %23 = arith.mulf %21, %22 : vector<1x128xf32>
    %c0_10 = arith.constant 0 : index
    %c0_11 = arith.constant 0 : index
    %24 = vector.load %arg5[%c0_10, %c0_11] : memref<1x128xf32, #tpu.memory_space<vmem>>, vector<1x128xf32>
    tpu.vector_store %arg5[%c0_10, %c0_11], %23 {strides = array<i32>} : memref<1x128xf32, #tpu.memory_space<vmem>>, vector<1x128xf32>,
    return
  }
  func.func @transform_0(%arg0: i32) -> i32 {
    %c0_i32 = arith.constant 0 : i32
    %c0_i32_0 = arith.constant 0 : i32
    return %c0_i32 : i32
  }
  func.func @transform_1(%arg0: i32) -> (i32, i32) {
    %c0_i32 = arith.constant 0 : i32
    %c0_i32_0 = arith.constant 0 : i32
    return %c0_i32, %arg0 : i32, i32
  }
  func.func @transform_2(%arg0: i32) -> (i32, i32) {
    %c0_i32 = arith.constant 0 : i32
    %c0_i32_0 = arith.constant 0 : i32
    return %c0_i32, %arg0 : i32, i32
  }
  func.func @transform_3(%arg0: i32) -> (i32, i32) {
    %c0_i32 = arith.constant 0 : i32
    %c0_i32_0 = arith.constant 0 : i32
    return %c0_i32, %arg0 : i32, i32
  }
  func.func @transform_4(%arg0: i32) -> (i32, i32) {
    %c0_i32 = arith.constant 0 : i32
    %c0_i32_0 = arith.constant 0 : i32
    return %c0_i32, %arg0 : i32, i32
  }
}

</mosaic_0001>

<bundles_post_ra>
// kernel: tpu_custom_call.1
= control target key start
LH: loop header
LB: loop body
LE: loop exit
PB: predicated region body
PF: predicated region fallthrough
CT: control target
= control target key end

     0   :  { %10 = vsyncpa [#allocation4], 0  ;;  %s352_s0 = inlined_call_operand.<no memory space> [shape: f32[1], index: 0, kind: input, shape index: {}]   ;;  %s353_s1 = inlined_call_operand.vmem [shape: f32[1,128], index: 1, kind: input, shape index: {}]   ;;  %s354_s2 = inlined_call_operand.hbm [shape: f32[49,128], index: 2, kind: input, shape index: {}]   ;;  %s355_s3 = inlined_call_operand.hbm [shape: f32[49,128], index: 3, kind: input, shape index: {}]   ;;  %s356_s4 = inlined_call_operand.hbm [shape: f32[1,128], index: 4, kind: output, shape index: {}]  }
   0x1   :  { %11 = vsyncpa [#allocation7], 0 }
   0x2   :  { %12 = vsyncpa [#allocation5], 0  ;;  %s274_s15 = smov [#allocation3]   ;;  %s202_s19 = scalar_lea.hbm %s354_s2, 896 }
   0x3   :  { %s22_s16 = sshll.u32 %s274_s15, 4  ;;  %p203_p0 = scmp.ne.s32.totalorder %s354_s2, %s202_s19  ;;  %s23_s16 = int_to_ptr.vmem [resolvable:$true] %s22_s16 }
   0x4   :  { %p206_p1 = scmp.lt.u32.totalorder %s202_s19, %s354_s2 }
   0x6   :  { %p208_p2 = pnand %p206_p1, %p203_p0 }
   0x8   :  { %211 = shalt.err (!%p208_p2)
}
   0x9   :  { %s212_s24 = scalar_lea.vmem %s23_s16, 896  ;;  %p217_p4 = scmp.lt.s32.totalorder %s23_s16, %s23_s16 }
   0xa   :  { %p213_p3 = scmp.ne.s32.totalorder %s23_s16, %s212_s24  ;;  %p218_p5 = scmp.lt.s32.totalorder %s212_s24, %s212_s24 }
   0xc   :  { %p219_p6 = por %p218_p5, %p217_p4 }
   0xe   :  { %p220_p7 = pnand %p219_p6, %p213_p3 }
  0x10   :  { %223 = shalt.err (!%p220_p7)
}
  0x11   :  { %s275_s25 = smov 128   ;;  %s276_s26 = smov 8  }
  0x12   :  { %28 = dma.hbm_to_vmem [thread:$0]  %s354_s2, 896, %s23_s16, [#allocation4], %s275_s25, %s275_s25, %s276_s26  }
  0x13   :  { %s277_s29 = smov [#allocation6]   ;;  %s224_s7 = scalar_lea.hbm %s355_s3, 896 }
  0x14   :  { %s34_s30 = sshll.u32 %s277_s29, 4  ;;  %p225_p8 = scmp.ne.s32.totalorder %s355_s3, %s224_s7  ;;  %s35_s30 = int_to_ptr.vmem [resolvable:$true] %s34_s30 }
  0x15   :  { %p228_p9 = scmp.lt.u32.totalorder %s224_s7, %s355_s3 }
  0x17   :  { %p230_p10 = pnand %p228_p9, %p225_p8 }
  0x19   :  { %233 = shalt.err (!%p230_p10)
}
  0x1a   :  { %s234_s12 = scalar_lea.vmem %s35_s30, 896  ;;  %p239_p12 = scmp.lt.s32.totalorder %s35_s30, %s35_s30 }
  0x1b   :  { %p235_p11 = scmp.ne.s32.totalorder %s35_s30, %s234_s12  ;;  %p240_p13 = scmp.lt.s32.totalorder %s234_s12, %s234_s12 }
  0x1d   :  { %p241_p0 = por %p240_p13, %p239_p12 }
  0x1f   :  { %p242_p1 = pnand %p241_p0, %p235_p11 }
  0x21   :  { %245 = shalt.err (!%p242_p1)
}
  0x22   :  { %40 = dma.hbm_to_vmem [thread:$0]  %s355_s3, 896, %s35_s30, [#allocation7], %s275_s25, %s275_s25, %s276_s26  }
  0x23   :  { %268 = dma.done.wait [#allocation4], 896  }
  0x24   :  { %269 = vsyncadd [#allocation4], 4294966400 }
  0x25   :  { %270 = dma.done.wait [#allocation7], 896  }
  0x26   :  { %271 = vsyncadd [#allocation7], 4294966400  ;;  %s48_s16 = smul.f32 0.5, %s352_s0  ;;  %v180_v0 = vld [vmem:[%s353_s1] ss:$0 sm:$0xff]  ;;  %v52_v2 = vld [vmem:[#allocation3 + $0x8] sm:$0xff] }
  0x27   :  { %v51_v1 = vld [vmem:[#allocation3] sm:$0xff]  ;;  %v53_v3 = vld [vmem:[#allocation3 + $0x10] sm:$0xff]  ;;  %v54_v4 = vld [vmem:[#allocation3 + $0x18] sm:$0xff]  ;;  %v72_v7 = vsub.f32 %v180_v0, %v52_v2  ;;  %vm95_vm0 = vcmask 1040384  }
  0x28   :  { %s49_s19 = smul.f32 %s48_s16, %s352_s0  ;;  %v55_v5 = vld [vmem:[#allocation3 + $0x20] sm:$0xff]  ;;  %v71_v6 = vsub.f32 %v180_v0, %v51_v1  ;;  %v56_v8 = vld [vmem:[#allocation3 + $0x28] sm:$0xff]  ;;  %v57_v9 = vld [vmem:[#allocation3 + $0x30] sm:$0x1]  ;;  %v73_v10 = vsub.f32 %v180_v0, %v53_v3  ;;  %v74_v11 = vsub.f32 %v180_v0, %v54_v4  ;;  %s278_s0 = smov [#allocation8]  }
  0x29   :  { %v75_v12 = vsub.f32 %v180_v0, %v55_v5  ;;  %v76_v14 = vsub.f32 %v180_v0, %v56_v8  ;;  %v77_v15 = vsub.f32 %v180_v0, %v57_v9  ;;  %v79_v17 = vmul.f32 %v72_v7, %v72_v7  ;;  %v58_v57 = vld [vmem:[#allocation6] sm:$0xff]  ;;  %v59_v58 = vld [vmem:[#allocation6 + $0x8] sm:$0xff]  ;;  %v60_v60 = vld [vmem:[#allocation6 + $0x10] sm:$0xff]  ;;  %s170_s1 = sshll.u32 %s278_s0, 4  ;;  %s171_s1 = int_to_ptr.vmem [resolvable:$true] %s170_s1 }
  0x2a   :  { %v85_v13 = vstv %s49_s19  ;;  %v78_v16 = vmul.f32 %v71_v6, %v71_v6  ;;  %v80_v18 = vmul.f32 %v73_v10, %v73_v10  ;;  %v81_v19 = vmul.f32 %v74_v11, %v74_v11  ;;  %v61_v62 = vld [vmem:[#allocation6 + $0x18] sm:$0xff]  ;;  %v62_v4 = vld [vmem:[#allocation6 + $0x20] sm:$0xff]  ;;  %v64_v6 = vld [vmem:[#allocation6 + $0x30] sm:$0x1]  ;;  %s246_s3 = scalar_lea.vmem %s171_s1, 16  ;;  %s250_s22 = scalar_lea.vmem %s171_s1, 32 }
  0x2b   :  { %v82_v20 = vmul.f32 %v75_v12, %v75_v12  ;;  %v83_v21 = vmul.f32 %v76_v14, %v76_v14  ;;  %v84_v22 = vmul.f32 %v77_v15, %v77_v15  ;;  %v87_v24 = vmul.f32 %v85_v13, %v79_v17  ;;  %v63_v11 = vld [vmem:[#allocation6 + $0x28] sm:$0xff]  ;;  %p247_p2 = scmp.ne.s32.totalorder %s171_s1, %s246_s3  ;;  %p251_p3 = scmp.lt.s32.totalorder %s171_s1, %s171_s1 }
  0x2c   :  { %v86_v23 = vmul.f32 %v85_v13, %v78_v16  ;;  %v88_v25 = vmul.f32 %v85_v13, %v80_v18  ;;  %v89_v29 = vmul.f32 %v85_v13, %v81_v19  ;;  %p252_p4 = scmp.lt.s32.totalorder %s250_s22, %s246_s3 }
  0x2d   :  { %v90_v26 = vmul.f32 %v85_v13, %v82_v20  ;;  %v91_v27 = vmul.f32 %v85_v13, %v83_v21  ;;  %v92_v28 = vmul.f32 %v85_v13, %v84_v22 }
  0x2e   :  { %p253_p5 = por %p252_p4, %p251_p3 }
  0x2f   :  { %v93_v30 = vmax.f32 %v86_v23, %v90_v26  ;;  %v94_v31 = vmax.f32 %v87_v24, %v91_v27  ;;  %v96_v32 = vsel %vm95_vm0, %v92_v28, -inf }
  0x30   :  { %v97_v33 = vmax.f32 %v88_v25, %v96_v32  ;;  %p254_p6 = pnand %p253_p5, %p247_p2 }
  0x31   :  { %v98_v34 = vmax.f32 %v93_v30, %v94_v31 }
  0x32   :  { %v99_v35 = vmax.f32 %v97_v33, %v89_v29 }
  0x34   :  { %v100_v36 = vmax.f32 %v98_v34, %v99_v35 }
  0x36   :  { %v101_v37 = vrot.slane %v100_v36, 4 }
  0x38   :  { %v102_v38 = vmax.f32 %v100_v36, %v101_v37 }
  0x3a   :  { %v103_v39 = vrot.slane %v102_v38, 2 }
  0x3c   :  { %v104_v40 = vmax.f32 %v102_v38, %v103_v39 }
  0x3e   :  { %v105_v41 = vrot.slane %v104_v40, 1 }
  0x40   :  { %v106_v42 = vmax.f32 %v104_v40, %v105_v41 }
  0x42   :  { %v107_v43 = vsub.f32 %v86_v23, %v106_v42  ;;  %v108_v44 = vsub.f32 %v87_v24, %v106_v42  ;;  %v109_v45 = vsub.f32 %v88_v25, %v106_v42  ;;  %v110_v46 = vsub.f32 %v89_v29, %v106_v42 }
  0x43   :  { %v111_v47 = vsub.f32 %v90_v26, %v106_v42  ;;  %v113_v48 = vsub.f32 %v92_v28, %v106_v42  ;;  %v112_v52 = vsub.f32 %v91_v27, %v106_v42 }
  0x44   :  { %v114_v49 = vmul.f32 1.442695, %v107_v43  ;;  %v116_v50 = vmul.f32 1.442695, %v108_v44  ;;  %v118_v51 = vmul.f32 1.442695, %v109_v45 }
  0x45   :  { %v120_v53 = vmul.f32 1.442695, %v110_v46  ;;  %v122_v54 = vmul.f32 1.442695, %v111_v47  ;;  %v126_v55 = vmul.f32 1.442695, %v113_v48 }
  0x46   :  { %186 = vpow2.f32 %v114_v49  ;;  %v124_v56 = vmul.f32 1.442695, %v112_v52 }
  0x47   :  { %188 = vpow2.f32 %v116_v50 }
  0x48   :  { %190 = vpow2.f32 %v118_v51 }
  0x49   :  { %192 = vpow2.f32 %v120_v53 }
  0x4a   :  { %194 = vpow2.f32 %v122_v54 }
  0x4b   :  { %196 = vpow2.f32 %v126_v55 }
  0x4c   :  { %198 = vpow2.f32 %v124_v56 }
  0x50   :  { %v187_v59 = vpop.eup %186 }
  0x51   :  { %v189_v61 = vpop.eup %188  ;;  %v141_v63 = vmul.f32 %v187_v59, %v58_v57 }
  0x52   :  { %v191_v0 = vpop.eup %190  ;;  %v128_v1 = vadd.f32 %v189_v61, %v187_v59  ;;  %v142_v2 = vmul.f32 %v189_v61, %v59_v58 }
  0x53   :  { %v193_v3 = vpop.eup %192  ;;  %v143_v5 = vmul.f32 %v191_v0, %v60_v60 }
  0x54   :  { %v129_v7 = vadd.f32 %v191_v0, %v128_v1  ;;  %v144_v8 = vmul.f32 %v193_v3, %v61_v62  ;;  %v148_v9 = vadd.f32 %v142_v2, %v141_v63  ;;  %v195_v10 = vpop.eup %194 }
  0x55   :  { %v197_v12 = vpop.eup %196  ;;  %v145_v14 = vmul.f32 %v195_v10, %v62_v4 }
  0x56   :  { %v130_v13 = vadd.f32 %v193_v3, %v129_v7  ;;  %v149_v15 = vadd.f32 %v148_v9, %v143_v5  ;;  %v199_v16 = vpop.eup %198  ;;  %v147_v17 = vmul.f32 %v197_v12, %v64_v6  ;;  %v133_v21 = vsel %vm95_vm0, %v197_v12, 0.0 }
  0x57   :  { %v146_v19 = vmul.f32 %v199_v16, %v63_v11 }
  0x58   :  { %v131_v18 = vadd.f32 %v195_v10, %v130_v13  ;;  %v150_v20 = vadd.f32 %v149_v15, %v144_v8  ;;  %v153_v24 = vsel %vm95_vm0, %v147_v17, 0.0 }
  0x5a   :  { %v132_v22 = vadd.f32 %v199_v16, %v131_v18  ;;  %v151_v23 = vadd.f32 %v150_v20, %v145_v14 }
  0x5c   :  { %v134_v25 = vadd.f32 %v133_v21, %v132_v22  ;;  %v152_v26 = vadd.f32 %v151_v23, %v146_v19 }
  0x5e   :  { %v135_v27 = vrot.slane %v134_v25, 4  ;;  %v154_v28 = vadd.f32 %v153_v24, %v152_v26 }
  0x60   :  { %v136_v29 = vadd.f32 %v135_v27, %v134_v25  ;;  %v155_v30 = vrot.slane %v154_v28, 4 }
  0x62   :  { %v137_v31 = vrot.slane %v136_v29, 2  ;;  %v156_v32 = vadd.f32 %v155_v30, %v154_v28 }
  0x64   :  { %v138_v33 = vadd.f32 %v137_v31, %v136_v29  ;;  %v157_v34 = vrot.slane %v156_v32, 2 }
  0x66   :  { %v139_v35 = vrot.slane %v138_v33, 1  ;;  %v158_v37 = vadd.f32 %v157_v34, %v156_v32 }
  0x68   :  { %v140_v36 = vadd.f32 %v139_v35, %v138_v33  ;;  %v159_v38 = vrot.slane %v158_v37, 1 }
  0x6a   :  { %200 = vrcp.f32 %v140_v36  ;;  %v160_v39 = vadd.f32 %v159_v38, %v158_v37 }
  0x74   :  { %v201_v40 = vpop.eup %200 }
  0x75   :  { %v162_v41 = vmul.f32 %v201_v40, %v160_v39 }
  0x77   :  { %163 = vst [vmem:[#allocation8] sm:$0x1] %v162_v41 }
  0x78   :  { %257 = shalt.err (!%p254_p6)
}
  0x79   :  { %s258_s25 = scalar_lea.hbm %s356_s4, 16 }
  0x7a   :  { %p259_p7 = scmp.ne.s32.totalorder %s356_s4, %s258_s25  ;;  %p262_p8 = scmp.lt.u32.totalorder %s258_s25, %s356_s4 }
  0x7c   :  { %p264_p9 = pnand %p262_p8, %p259_p7 }
  0x7e   :  { %267 = shalt.err (!%p264_p9)
}
  0x7f   :  { %173 = dma.vmem_to_hbm [thread:$0]  %s171_s1, 16, %s356_s4, [#allocation5]  }
  0x80   :  { %272 = dma.done.wait [#allocation5], 16  }
  0x81   :  { %273 = vsyncadd [#allocation5], 4294967280 }
  0x82   :  { %177 = vsyncpa [#allocation4], 1 }
  0x83   :  { %178 = vsyncpa [#allocation7], 1 }
  0x84   :  { %179 = vsyncpa [#allocation5], 1 }

</bundles_post_ra>
